<compile_context>
chip_gen: v7x
topology: tpu7x:2x2x1
jax: 0.10.0
libtpu: 0.0.40
codegen_flags: <defaults>
</compile_context>

<pallas_src>
import jax
import jax.numpy as jnp
from jax.experimental import pallas as pl
from jax.experimental.pallas import tpu as pltpu

BN_EPS = 1e-5
LRP_EPS = 1e-5
LANE = 128


def _ceil_to(x, m):
    return ((x + m - 1) // m) * m


def _pick_tm(M):
    """Pick an M tile: prefer >=4 parallel blocks (v7x megacore), then >=2,
    else a single whole-(padded)-M tile. Returns (tm, num_blocks)."""
    mp0 = _ceil_to(M, LANE)
    for want in (4, 2):
        for tm in (512, 256, 128):
            nb = -(-mp0 // tm)
            if nb >= want:
                return tm, nb
    return mp0, 1


# ------------------- fused matmul kernel (conv via im2col) -------------------

def _build_kernel(epilogue, nk):
    """Matmul with a fused per-tile epilogue.

      none    : o = z
      bn      : o = z * scale + shift                (per output column)
      bn_relu : o = relu(z * scale + shift)
      bn_gate : o = relu-if-gate(z * scale + shift)  (per-column relu gate)
      div     : o = aux / (z + eps)                  (LRP: s = r / (z + eps))
      mul     : o = aux * z                          (LRP: r = a * c)

    nk == 1 : 1-D grid over M tiles, no accumulator (dot + epilogue + store).
    nk  > 1 : 2-D grid (M, K) with an f32 VMEM accumulator; epilogue at k==last.
    """

    def apply_epilogue(z, extra, o_ref):
        if epilogue == "bn_gate":
            s_ref, b_ref, g_ref = extra
            z = z * s_ref[...] + b_ref[...]
            o_ref[...] = jnp.where(g_ref[...] > 0.0, jnp.maximum(z, 0.0), z)
        elif epilogue == "bn":
            s_ref, b_ref = extra
            o_ref[...] = z * s_ref[...] + b_ref[...]
        elif epilogue == "bn_relu":
            s_ref, b_ref = extra
            o_ref[...] = jnp.maximum(z * s_ref[...] + b_ref[...], 0.0)
        elif epilogue == "div":
            (aux_ref,) = extra
            o_ref[...] = aux_ref[...] / (z + LRP_EPS)
        elif epilogue == "mul":
            (aux_ref,) = extra
            o_ref[...] = aux_ref[...] * z
        else:
            o_ref[...] = z

    if nk == 1:
        def kernel(x_ref, w_ref, *rest):
            *extra, o_ref = rest
            z = jnp.dot(x_ref[...], w_ref[...],
                        preferred_element_type=jnp.float32)
            apply_epilogue(z, extra, o_ref)
        return kernel

    def kernel(x_ref, w_ref, *rest):
        *extra, o_ref, acc_ref = rest

        @pl.when(pl.program_id(1) == 0)
        def _():
            acc_ref[...] = jnp.zeros_like(acc_ref)

        acc_ref[...] += jnp.dot(x_ref[...], w_ref[...],
                                preferred_element_type=jnp.float32)

        @pl.when(pl.program_id(1) == nk - 1)
        def _():
            apply_epilogue(acc_ref[...], extra, o_ref)

    return kernel


def fused_matmul(x, w, *, epilogue="none", scale=None, shift=None, gate=None,
                 aux=None):
    """x: [M, K] @ w: [K, Co] -> [M, Co] f32 with a fused epilogue.

    MXU operands run in bf16 (preferred_element_type=f32).  K is zero-padded to
    a multiple of 128 (full-lane loads / bf16 sublane packing), Co is padded to
    a multiple of 128 (lane-dense unmasked stores), M is padded to a multiple
    of the chosen tile.  scale/shift/gate are (Co,) per-column vectors; aux is
    an (M, Co) elementwise f32 operand.
    """
    M, K = x.shape
    Kw, Co = w.shape
    assert K == Kw
    np_ = _ceil_to(Co, LANE)

    kp = _ceil_to(K, LANE)
    if kp <= 1024:
        tk, nk = kp, 1
    else:
        tk = 512
        kp = _ceil_to(K, tk)
        nk = kp // tk

    tm, nm = _pick_tm(M)
    mp = tm * nm

    xp = x if (mp, kp) == (M, K) else jnp.pad(x, ((0, mp - M), (0, kp - K)))
    xp = xp.astype(jnp.bfloat16)
    wp = w if (kp, np_) == (K, Co) else jnp.pad(w, ((0, kp - K), (0, np_ - Co)))
    wp = wp.astype(jnp.bfloat16)

    if nk == 1:
        grid = (nm,)
        x_spec = pl.BlockSpec((tm, kp), lambda i: (i, 0))
        w_spec = pl.BlockSpec((kp, np_), lambda i: (0, 0))
        vec_spec = pl.BlockSpec((1, np_), lambda i: (0, 0))
        mat_spec = pl.BlockSpec((tm, np_), lambda i: (i, 0))
        scratch = []
        dims = ("parallel",)
    else:
        grid = (nm, nk)
        x_spec = pl.BlockSpec((tm, tk), lambda i, k: (i, k))
        w_spec = pl.BlockSpec((tk, np_), lambda i, k: (k, 0))
        vec_spec = pl.BlockSpec((1, np_), lambda i, k: (0, 0))
        mat_spec = pl.BlockSpec((tm, np_), lambda i, k: (i, 0))
        scratch = [pltpu.VMEM((tm, np_), jnp.float32)]
        dims = ("parallel", "arbitrary")

    in_arrays = [xp, wp]
    in_specs = [x_spec, w_spec]
    if epilogue in ("bn", "bn_relu", "bn_gate"):
        sv = jnp.pad(scale.astype(jnp.float32), (0, np_ - Co)).reshape(1, np_)
        bv = jnp.pad(shift.astype(jnp.float32), (0, np_ - Co)).reshape(1, np_)
        in_arrays += [sv, bv]
        in_specs += [vec_spec, vec_spec]
        if epilogue == "bn_gate":
            gv = jnp.pad(gate.astype(jnp.float32), (0, np_ - Co)).reshape(1, np_)
            in_arrays += [gv]
            in_specs += [vec_spec]
    elif epilogue in ("div", "mul"):
        av = aux.astype(jnp.float32)
        if (mp, np_) != (M, Co):
            av = jnp.pad(av, ((0, mp - M), (0, np_ - Co)))
        in_arrays += [av]
        in_specs += [mat_spec]

    out = pl.pallas_call(
        _build_kernel(epilogue, nk),
        out_shape=jax.ShapeDtypeStruct((mp, np_), jnp.float32),
        grid=grid,
        in_specs=in_specs,
        out_specs=mat_spec,
        scratch_shapes=scratch,
        compiler_params=pltpu.CompilerParams(
            dimension_semantics=dims,
            vmem_limit_bytes=32 * 1024 * 1024),
    )(*in_arrays)
    return out[:M, :Co]


# ------------------------- conv plumbing (NHWC, im2col) ----------------------

def _im2col_nhwc(x, kh, kw, stride, pad):
    """x: [N, H, W, C] -> patches [N*Ho*Wo, kh*kw*C] (K ordered as (kh, kw, C)).
    Call with bf16 activations so the amplified patch tensor is bf16."""
    # TODO(synk): patch extraction stays in plain JAX (kh*kw HBM amplification
    # for 3x3 kernels); folding the gather into the Pallas kernel needs manual
    # per-row DMA and is not worthwhile at these spatial sizes.
    n, h, w, c = x.shape
    if pad:
        x = jnp.pad(x, ((0, 0), (pad, pad), (pad, pad), (0, 0)))
    ho = (h + 2 * pad - kh) // stride + 1
    wo = (w + 2 * pad - kw) // stride + 1
    if kh == 1 and kw == 1:
        patches = x[:, ::stride, ::stride, :]
    else:
        cols = []
        for i in range(kh):
            for j in range(kw):
                cols.append(x[:, i:i + stride * (ho - 1) + 1:stride,
                                j:j + stride * (wo - 1) + 1:stride, :])
        patches = jnp.concatenate(cols, axis=-1)
    return patches.reshape(n * ho * wo, kh * kw * c), ho, wo


def _wmat(w):
    """[Cout, Cin, kh, kw] -> [kh*kw*Cin, Cout], matching _im2col_nhwc K order."""
    cout, cin, kh, kw = w.shape
    return jnp.transpose(w, (2, 3, 1, 0)).reshape(kh * kw * cin, cout)


# ------------------------------- LRP BasicBlock -----------------------------

def relevance_propagation_basic_block(params, a, r):
    """a: [N, Cin, H, W] (block input, NCHW); r: [N, Cout, H//2, W//2]."""
    p = params
    n, cin, h, w_sp = a.shape
    cout = r.shape[1]
    assert h % 2 == 0 and w_sp % 2 == 0, "stride-2 BasicBlock expects even H/W"
    ho, wo = h // 2, w_sp // 2
    assert r.shape == (n, cout, ho, wo)

    a_nhwc = jnp.transpose(a, (0, 2, 3, 1)).astype(jnp.float32)
    r_nhwc = jnp.transpose(r, (0, 2, 3, 1)).astype(jnp.float32)
    a_bf = a_nhwc.astype(jnp.bfloat16)

    def fold_bn(g, b, m, v):
        s = g / jnp.sqrt(v + BN_EPS)
        return s, b - m * s

    s1, b1 = fold_bn(p["bn1_g"], p["bn1_b"], p["bn1_m"], p["bn1_v"])
    s2, b2 = fold_bn(p["bn2_g"], p["bn2_b"], p["bn2_m"], p["bn2_v"])
    sd, bd = fold_bn(p["dbn_g"], p["dbn_b"], p["dbn_m"], p["dbn_v"])

    w1, w2, wd = p["conv1_w"], p["conv2_w"], p["down_w"]

    # Shared im2col of the block input (3x3, stride 2, pad 1); the 1x1 stride-2
    # downsample conv is exactly the centre tap of these patches.
    patches_a, ho2, wo2 = _im2col_nhwc(a_bf, 3, 3, 2, 1)
    assert (ho2, wo2) == (ho, wo)
    m1 = n * ho * wo

    # --- call 1: fused forward  conv1(+bn1+relu)  and  downsample(+bn_d) -----
    w1_mat = _wmat(w1)                                        # [9*cin, cout]
    wd_embed = jnp.zeros((9 * cin, cout), jnp.float32)
    wd_embed = wd_embed.at[4 * cin:5 * cin, :].set(_wmat(wd))  # centre-tap rows
    fwd = fused_matmul(
        patches_a, jnp.concatenate([w1_mat, wd_embed], axis=1),
        epilogue="bn_gate",
        scale=jnp.concatenate([s1, sd]),
        shift=jnp.concatenate([b1, bd]),
        gate=jnp.concatenate([jnp.ones((cout,), jnp.float32),
                              jnp.zeros((cout,), jnp.float32)]))
    a3_mat = fwd[:, :cout]            # relu(bn1(conv1(a)))   [m1, cout] f32
    short_mat = fwd[:, cout:]         # bn_d(downsample(a))   [m1, cout] f32
    a3 = a3_mat.reshape(n, ho, wo, cout)
    a3_bf = a3.astype(jnp.bfloat16)

    # --- call 2: conv2 forward (+bn2) on shared a3 patches --------------------
    patches_a3, _, _ = _im2col_nhwc(a3_bf, 3, 3, 1, 1)        # [m1, 9*cout]
    main_mat = fused_matmul(patches_a3, _wmat(w2),
                            epilogue="bn", scale=s2, shift=b2)

    # --- relevance split (plain jnp, XLA fuses) -------------------------------
    denom = jnp.abs(main_mat) + jnp.abs(short_mat)
    ratio = jnp.abs(main_mat) / jnp.where(denom == 0.0, 1.0, denom)
    r_mat = r_nhwc.reshape(m1, cout)
    r_main_mat = ratio * r_mat
    r_short_mat = (1.0 - ratio) * r_mat

    # --- call 3: conv2 LRP "div"  s2 = r_main / (conv(a3, W2+) + eps) ---------
    w2p = jnp.maximum(w2, 0.0)
    s2_mat = fused_matmul(patches_a3, _wmat(w2p),
                          epilogue="div", aux=r_main_mat)
    s2_f = s2_mat.reshape(n, ho, wo, cout)

    # --- call 4: conv2 LRP gradient (stride-1 transposed conv) + "mul" --------
    w2f = jnp.transpose(jnp.flip(w2p, axis=(2, 3)), (1, 0, 2, 3))
    gpatches, _, _ = _im2col_nhwc(s2_f.astype(jnp.bfloat16), 3, 3, 1, 1)
    r_a3_mat = fused_matmul(gpatches, _wmat(w2f),
                            epilogue="mul", aux=a3_mat)       # r at conv1 output

    # --- call 5: fused LRP "div" for conv1 and downsample (shared patches) ----
    sdiv = fused_matmul(
        patches_a,
        jnp.concatenate([jnp.maximum(w1_mat, 0.0),
                         jnp.maximum(wd_embed, 0.0)], axis=1),
        epilogue="div",
        aux=jnp.concatenate([r_a3_mat, r_short_mat], axis=1))
    s1_f = sdiv[:, :cout].reshape(n, ho, wo, cout)
    sd_mat = sdiv[:, cout:]

    # --- call 6: polyphase transposed-conv gradient for conv1 + downsample ----
    # The stride-2 input-gradient conv is computed without dilation: a 2x2
    # window over s1 (zero-padded bottom/right) against a phase weight matrix
    # producing (2x2 phases) x Cin columns, pixel-shuffled back to [N,H,W,Cin].
    # The downsample gradient only hits phase (0,0), so its weights are folded
    # into the same matmul and  r = a * (c_main + c_short)  is the epilogue.
    w1p = jnp.maximum(w1, 0.0)
    wdp = jnp.maximum(wd, 0.0)
    g1 = jnp.zeros((2, 2, cout, 2, 2, cin), jnp.float32)
    for ty in range(2):
        for dy in range(2):
            i = dy - 2 * ty + 1
            if not 0 <= i <= 2:
                continue
            for tx in range(2):
                for dx in range(2):
                    j = dx - 2 * tx + 1
                    if not 0 <= j <= 2:
                        continue
                    g1 = g1.at[ty, tx, :, dy, dx, :].set(w1p[:, :, i, j])
    g1 = g1.reshape(4 * cout, 4 * cin)
    gd = jnp.zeros((cout, 2, 2, cin), jnp.float32)
    gd = gd.at[:, 0, 0, :].set(wdp[:, :, 0, 0]).reshape(cout, 4 * cin)

    s1_pad = jnp.pad(s1_f.astype(jnp.bfloat16), ((0, 0), (0, 1), (0, 1), (0, 0)))
    phase_patches = jnp.concatenate(
        [s1_pad[:, ty:ty + ho, tx:tx + wo, :]
         for ty in range(2) for tx in range(2)],
        axis=-1).reshape(m1, 4 * cout)
    k_comb = jnp.concatenate([phase_patches, sd_mat.astype(jnp.bfloat16)],
                             axis=1)                           # [m1, 5*cout]
    a_phase = a_nhwc.reshape(n, ho, 2, wo, 2, cin) \
                    .transpose(0, 1, 3, 2, 4, 5).reshape(m1, 4 * cin)

    r_phase = fused_matmul(k_comb, jnp.concatenate([g1, gd], axis=0),
                           epilogue="mul", aux=a_phase)        # [m1, 4*cin]
    r_out = r_phase.reshape(n, ho, wo, 2, 2, cin) \
                   .transpose(0, 1, 3, 2, 4, 5).reshape(n, h, w_sp, cin)
    return jnp.transpose(r_out, (0, 3, 1, 2))


# ---------------------------------- main ------------------------------------

if __name__ == "__main__":
    key = jax.random.PRNGKey(0)
    ks = jax.random.split(key, 20)

    N, Cin, H, W = 2, 4, 16, 16
    Cout = 8                                  # BasicBlock with stride-2 downsample
    a = jax.random.normal(ks[0], (N, Cin, H, W), jnp.float32)
    r = jax.random.uniform(ks[1], (N, Cout, H // 2, W // 2), jnp.float32)

    def bn_params(k0, k1, k2, k3, c):
        return (jax.random.uniform(ks[k0], (c,), jnp.float32, 0.5, 1.5),  # gamma
                jax.random.normal(ks[k1], (c,), jnp.float32) * 0.1,       # beta
                jax.random.normal(ks[k2], (c,), jnp.float32) * 0.1,       # mean
                jax.random.uniform(ks[k3], (c,), jnp.float32, 0.5, 1.5))  # var

    bn1 = bn_params(3, 4, 5, 6, Cout)
    bn2 = bn_params(7, 8, 9, 10, Cout)
    dbn = bn_params(11, 12, 13, 14, Cout)

    params = {
        "conv1_w": jax.random.normal(ks[2], (Cout, Cin, 3, 3), jnp.float32) * 0.2,
        "conv2_w": jax.random.normal(ks[15], (Cout, Cout, 3, 3), jnp.float32) * 0.2,
        "down_w": jax.random.normal(ks[16], (Cout, Cin, 1, 1), jnp.float32) * 0.2,
        "bn1_g": bn1[0], "bn1_b": bn1[1], "bn1_m": bn1[2], "bn1_v": bn1[3],
        "bn2_g": bn2[0], "bn2_b": bn2[1], "bn2_m": bn2[2], "bn2_v": bn2[3],
        "dbn_g": dbn[0], "dbn_b": dbn[1], "dbn_m": dbn[2], "dbn_v": dbn[3],
    }

    fwd = jax.jit(relevance_propagation_basic_block)
    out = fwd(params, a, r)
    out = jax.block_until_ready(out)

    assert out.shape == a.shape, (out.shape, a.shape)
    assert bool(jnp.all(jnp.isfinite(out)))
    print("KERNEL_OK")
</pallas_src>

<mosaic_0001>
module attributes {stable_mosaic.version = 11 : i64} {
  func.func @kernel(%arg0: i32, %arg1: memref<128x128xbf16, #tpu.memory_space<vmem>>, %arg2: memref<128x128xbf16, #tpu.memory_space<vmem>>, %arg3: memref<1x128xf32, #tpu.memory_space<vmem>>, %arg4: memref<1x128xf32, #tpu.memory_space<vmem>>, %arg5: memref<1x128xf32, #tpu.memory_space<vmem>>, %arg6: memref<128x128xf32, #tpu.memory_space<vmem>>) attributes {dimension_semantics = [#tpu.dimension_semantics<parallel>], iteration_bounds = array<i64: 1>, scalar_prefetch = 0 : i64, scratch_operands = 0 : i64, tpu.core_type = #tpu.core_type<tc>, window_params = [{transform_indices = @transform_0, window_bounds = array<i64: 128, 128>}, {pipeline_mode = #tpu.pipeline_mode<synchronous>, transform_indices = @transform_1, window_bounds = array<i64: 128, 128>}, {pipeline_mode = #tpu.pipeline_mode<synchronous>, transform_indices = @transform_2, window_bounds = array<i64: 1, 128>}, {pipeline_mode = #tpu.pipeline_mode<synchronous>, transform_indices = @transform_3, window_bounds = array<i64: 1, 128>}, {pipeline_mode = #tpu.pipeline_mode<synchronous>, transform_indices = @transform_4, window_bounds = array<i64: 1, 128>}, {transform_indices = @transform_5, window_bounds = array<i64: 128, 128>}]} {
    %c0 = arith.constant 0 : index
    %c0_0 = arith.constant 0 : index
    %0 = vector.load %arg1[%c0, %c0_0] : memref<128x128xbf16, #tpu.memory_space<vmem>>, vector<128x128xbf16>
    %c0_1 = arith.constant 0 : index
    %c0_2 = arith.constant 0 : index
    %1 = vector.load %arg2[%c0_1, %c0_2] : memref<128x128xbf16, #tpu.memory_space<vmem>>, vector<128x128xbf16>
    %cst = arith.constant dense<0.000000e+00> : vector<128x128xf32>
    %2 = tpu.matmul %0, %1, %cst {dimension_numbers = #tpu.dot_dimension_numbers<[1], [0], [0], [1], [0, 0, 1, 1], [], []>} : vector<128x128xbf16>, vector<128x128xbf16>, vector<128x128xf32> -> vector<128x128xf32>
    %c0_3 = arith.constant 0 : index
    %c0_4 = arith.constant 0 : index
    %3 = vector.load %arg3[%c0_3, %c0_4] : memref<1x128xf32, #tpu.memory_space<vmem>>, vector<1x128xf32>
    %4 = vector.broadcast %3 : vector<1x128xf32> to vector<128x128xf32>
    %5 = arith.mulf %2, %4 : vector<128x128xf32>
    %c0_5 = arith.constant 0 : index
    %c0_6 = arith.constant 0 : index
    %6 = vector.load %arg4[%c0_5, %c0_6] : memref<1x128xf32, #tpu.memory_space<vmem>>, vector<1x128xf32>
    %7 = vector.broadcast %6 : vector<1x128xf32> to vector<128x128xf32>
    %8 = arith.addf %5, %7 : vector<128x128xf32>
    %c0_7 = arith.constant 0 : index
    %c0_8 = arith.constant 0 : index
    %9 = vector.load %arg5[%c0_7, %c0_8] : memref<1x128xf32, #tpu.memory_space<vmem>>, vector<1x128xf32>
    %cst_9 = arith.constant 0.000000e+00 : f32
    %10 = vector.broadcast %cst_9 : f32 to vector<1x128xf32>
    %11 = arith.cmpf ogt, %9, %10 : vector<1x128xf32>
    %cst_10 = arith.constant 0.000000e+00 : f32
    %12 = vector.broadcast %cst_10 : f32 to vector<128x128xf32>
    %13 = arith.maximumf %8, %12 : vector<128x128xf32>
    %14 = vector.shape_cast %11 : vector<1x128xi1> to vector<1x128xi1>
    %15 = vector.broadcast %14 : vector<1x128xi1> to vector<128x128xi1>
    %16 = arith.select %15, %13, %8 : vector<128x128xi1>, vector<128x128xf32>
    %c0_11 = arith.constant 0 : index
    %c0_12 = arith.constant 0 : index
    %17 = vector.load %arg6[%c0_11, %c0_12] : memref<128x128xf32, #tpu.memory_space<vmem>>, vector<128x128xf32>
    tpu.vector_store %arg6[%c0_11, %c0_12], %16 {strides = array<i32>} : memref<128x128xf32, #tpu.memory_space<vmem>>, vector<128x128xf32>,
    return
  }
  func.func @transform_0(%arg0: i32) -> (i32, i32) {
    %c0_i32 = arith.constant 0 : i32
    %c0_i32_0 = arith.constant 0 : i32
    return %arg0, %c0_i32 : i32, i32
  }
  func.func @transform_1(%arg0: i32) -> (i32, i32) {
    %c0_i32 = arith.constant 0 : i32
    %c0_i32_0 = arith.constant 0 : i32
    %c0_i32_1 = arith.constant 0 : i32
    return %c0_i32, %c0_i32_0 : i32, i32
  }
  func.func @transform_2(%arg0: i32) -> (i32, i32) {
    %c0_i32 = arith.constant 0 : i32
    %c0_i32_0 = arith.constant 0 : i32
    %c0_i32_1 = arith.constant 0 : i32
    return %c0_i32, %c0_i32_0 : i32, i32
  }
  func.func @transform_3(%arg0: i32) -> (i32, i32) {
    %c0_i32 = arith.constant 0 : i32
    %c0_i32_0 = arith.constant 0 : i32
    %c0_i32_1 = arith.constant 0 : i32
    return %c0_i32, %c0_i32_0 : i32, i32
  }
  func.func @transform_4(%arg0: i32) -> (i32, i32) {
    %c0_i32 = arith.constant 0 : i32
    %c0_i32_0 = arith.constant 0 : i32
    %c0_i32_1 = arith.constant 0 : i32
    return %c0_i32, %c0_i32_0 : i32, i32
  }
  func.func @transform_5(%arg0: i32) -> (i32, i32) {
    %c0_i32 = arith.constant 0 : i32
    %c0_i32_0 = arith.constant 0 : i32
    return %arg0, %c0_i32 : i32, i32
  }
}

module attributes {stable_mosaic.version = 11 : i64} {
  func.func @kernel(%arg0: i32, %arg1: memref<128x128xbf16, #tpu.memory_space<vmem>>, %arg2: memref<128x128xbf16, #tpu.memory_space<vmem>>, %arg3: memref<1x128xf32, #tpu.memory_space<vmem>>, %arg4: memref<1x128xf32, #tpu.memory_space<vmem>>, %arg5: memref<128x128xf32, #tpu.memory_space<vmem>>) attributes {dimension_semantics = [#tpu.dimension_semantics<parallel>], iteration_bounds = array<i64: 1>, scalar_prefetch = 0 : i64, scratch_operands = 0 : i64, tpu.core_type = #tpu.core_type<tc>, window_params = [{transform_indices = @transform_0, window_bounds = array<i64: 128, 128>}, {pipeline_mode = #tpu.pipeline_mode<synchronous>, transform_indices = @transform_1, window_bounds = array<i64: 128, 128>}, {pipeline_mode = #tpu.pipeline_mode<synchronous>, transform_indices = @transform_2, window_bounds = array<i64: 1, 128>}, {pipeline_mode = #tpu.pipeline_mode<synchronous>, transform_indices = @transform_3, window_bounds = array<i64: 1, 128>}, {transform_indices = @transform_4, window_bounds = array<i64: 128, 128>}]} {
    %c0 = arith.constant 0 : index
    %c0_0 = arith.constant 0 : index
    %0 = vector.load %arg1[%c0, %c0_0] : memref<128x128xbf16, #tpu.memory_space<vmem>>, vector<128x128xbf16>
    %c0_1 = arith.constant 0 : index
    %c0_2 = arith.constant 0 : index
    %1 = vector.load %arg2[%c0_1, %c0_2] : memref<128x128xbf16, #tpu.memory_space<vmem>>, vector<128x128xbf16>
    %cst = arith.constant dense<0.000000e+00> : vector<128x128xf32>
    %2 = tpu.matmul %0, %1, %cst {dimension_numbers = #tpu.dot_dimension_numbers<[1], [0], [0], [1], [0, 0, 1, 1], [], []>} : vector<128x128xbf16>, vector<128x128xbf16>, vector<128x128xf32> -> vector<128x128xf32>
    %c0_3 = arith.constant 0 : index
    %c0_4 = arith.constant 0 : index
    %3 = vector.load %arg3[%c0_3, %c0_4] : memref<1x128xf32, #tpu.memory_space<vmem>>, vector<1x128xf32>
    %4 = vector.broadcast %3 : vector<1x128xf32> to vector<128x128xf32>
    %5 = arith.mulf %2, %4 : vector<128x128xf32>
    %c0_5 = arith.constant 0 : index
    %c0_6 = arith.constant 0 : index
    %6 = vector.load %arg4[%c0_5, %c0_6] : memref<1x128xf32, #tpu.memory_space<vmem>>, vector<1x128xf32>
    %7 = vector.broadcast %6 : vector<1x128xf32> to vector<128x128xf32>
    %8 = arith.addf %5, %7 : vector<128x128xf32>
    %c0_7 = arith.constant 0 : index
    %c0_8 = arith.constant 0 : index
    %9 = vector.load %arg5[%c0_7, %c0_8] : memref<128x128xf32, #tpu.memory_space<vmem>>, vector<128x128xf32>
    tpu.vector_store %arg5[%c0_7, %c0_8], %8 {strides = array<i32>} : memref<128x128xf32, #tpu.memory_space<vmem>>, vector<128x128xf32>,
    return
  }
  func.func @transform_0(%arg0: i32) -> (i32, i32) {
    %c0_i32 = arith.constant 0 : i32
    %c0_i32_0 = arith.constant 0 : i32
    return %arg0, %c0_i32 : i32, i32
  }
  func.func @transform_1(%arg0: i32) -> (i32, i32) {
    %c0_i32 = arith.constant 0 : i32
    %c0_i32_0 = arith.constant 0 : i32
    %c0_i32_1 = arith.constant 0 : i32
    return %c0_i32, %c0_i32_0 : i32, i32
  }
  func.func @transform_2(%arg0: i32) -> (i32, i32) {
    %c0_i32 = arith.constant 0 : i32
    %c0_i32_0 = arith.constant 0 : i32
    %c0_i32_1 = arith.constant 0 : i32
    return %c0_i32, %c0_i32_0 : i32, i32
  }
  func.func @transform_3(%arg0: i32) -> (i32, i32) {
    %c0_i32 = arith.constant 0 : i32
    %c0_i32_0 = arith.constant 0 : i32
    %c0_i32_1 = arith.constant 0 : i32
    return %c0_i32, %c0_i32_0 : i32, i32
  }
  func.func @transform_4(%arg0: i32) -> (i32, i32) {
    %c0_i32 = arith.constant 0 : i32
    %c0_i32_0 = arith.constant 0 : i32
    return %arg0, %c0_i32 : i32, i32
  }
}

module attributes {stable_mosaic.version = 11 : i64} {
  func.func @kernel(%arg0: i32, %arg1: memref<128x128xbf16, #tpu.memory_space<vmem>>, %arg2: memref<128x128xbf16, #tpu.memory_space<vmem>>, %arg3: memref<128x128xf32, #tpu.memory_space<vmem>>, %arg4: memref<128x128xf32, #tpu.memory_space<vmem>>) attributes {dimension_semantics = [#tpu.dimension_semantics<parallel>], iteration_bounds = array<i64: 1>, scalar_prefetch = 0 : i64, scratch_operands = 0 : i64, tpu.core_type = #tpu.core_type<tc>, window_params = [{transform_indices = @transform_0, window_bounds = array<i64: 128, 128>}, {pipeline_mode = #tpu.pipeline_mode<synchronous>, transform_indices = @transform_1, window_bounds = array<i64: 128, 128>}, {transform_indices = @transform_2, window_bounds = array<i64: 128, 128>}, {transform_indices = @transform_3, window_bounds = array<i64: 128, 128>}]} {
    %c0 = arith.constant 0 : index
    %c0_0 = arith.constant 0 : index
    %0 = vector.load %arg1[%c0, %c0_0] : memref<128x128xbf16, #tpu.memory_space<vmem>>, vector<128x128xbf16>
    %c0_1 = arith.constant 0 : index
    %c0_2 = arith.constant 0 : index
    %1 = vector.load %arg2[%c0_1, %c0_2] : memref<128x128xbf16, #tpu.memory_space<vmem>>, vector<128x128xbf16>
    %cst = arith.constant dense<0.000000e+00> : vector<128x128xf32>
    %2 = tpu.matmul %0, %1, %cst {dimension_numbers = #tpu.dot_dimension_numbers<[1], [0], [0], [1], [0, 0, 1, 1], [], []>} : vector<128x128xbf16>, vector<128x128xbf16>, vector<128x128xf32> -> vector<128x128xf32>
    %c0_3 = arith.constant 0 : index
    %c0_4 = arith.constant 0 : index
    %3 = vector.load %arg3[%c0_3, %c0_4] : memref<128x128xf32, #tpu.memory_space<vmem>>, vector<128x128xf32>
    %4 = arith.mulf %3, %2 : vector<128x128xf32>
    %c0_5 = arith.constant 0 : index
    %c0_6 = arith.constant 0 : index
    %5 = vector.load %arg4[%c0_5, %c0_6] : memref<128x128xf32, #tpu.memory_space<vmem>>, vector<128x128xf32>
    tpu.vector_store %arg4[%c0_5, %c0_6], %4 {strides = array<i32>} : memref<128x128xf32, #tpu.memory_space<vmem>>, vector<128x128xf32>,
    return
  }
  func.func @transform_0(%arg0: i32) -> (i32, i32) {
    %c0_i32 = arith.constant 0 : i32
    %c0_i32_0 = arith.constant 0 : i32
    return %arg0, %c0_i32 : i32, i32
  }
  func.func @transform_1(%arg0: i32) -> (i32, i32) {
    %c0_i32 = arith.constant 0 : i32
    %c0_i32_0 = arith.constant 0 : i32
    %c0_i32_1 = arith.constant 0 : i32
    return %c0_i32, %c0_i32_0 : i32, i32
  }
  func.func @transform_2(%arg0: i32) -> (i32, i32) {
    %c0_i32 = arith.constant 0 : i32
    %c0_i32_0 = arith.constant 0 : i32
    return %arg0, %c0_i32 : i32, i32
  }
  func.func @transform_3(%arg0: i32) -> (i32, i32) {
    %c0_i32 = arith.constant 0 : i32
    %c0_i32_0 = arith.constant 0 : i32
    return %arg0, %c0_i32 : i32, i32
  }
}

module attributes {stable_mosaic.version = 11 : i64} {
  func.func @kernel(%arg0: i32, %arg1: memref<128x128xbf16, #tpu.memory_space<vmem>>, %arg2: memref<128x128xbf16, #tpu.memory_space<vmem>>, %arg3: memref<128x128xf32, #tpu.memory_space<vmem>>, %arg4: memref<128x128xf32, #tpu.memory_space<vmem>>) attributes {dimension_semantics = [#tpu.dimension_semantics<parallel>], iteration_bounds = array<i64: 1>, scalar_prefetch = 0 : i64, scratch_operands = 0 : i64, tpu.core_type = #tpu.core_type<tc>, window_params = [{transform_indices = @transform_0, window_bounds = array<i64: 128, 128>}, {pipeline_mode = #tpu.pipeline_mode<synchronous>, transform_indices = @transform_1, window_bounds = array<i64: 128, 128>}, {transform_indices = @transform_2, window_bounds = array<i64: 128, 128>}, {transform_indices = @transform_3, window_bounds = array<i64: 128, 128>}]} {
    %c0 = arith.constant 0 : index
    %c0_0 = arith.constant 0 : index
    %0 = vector.load %arg1[%c0, %c0_0] : memref<128x128xbf16, #tpu.memory_space<vmem>>, vector<128x128xbf16>
    %c0_1 = arith.constant 0 : index
    %c0_2 = arith.constant 0 : index
    %1 = vector.load %arg2[%c0_1, %c0_2] : memref<128x128xbf16, #tpu.memory_space<vmem>>, vector<128x128xbf16>
    %cst = arith.constant dense<0.000000e+00> : vector<128x128xf32>
    %2 = tpu.matmul %0, %1, %cst {dimension_numbers = #tpu.dot_dimension_numbers<[1], [0], [0], [1], [0, 0, 1, 1], [], []>} : vector<128x128xbf16>, vector<128x128xbf16>, vector<128x128xf32> -> vector<128x128xf32>
    %c0_3 = arith.constant 0 : index
    %c0_4 = arith.constant 0 : index
    %3 = vector.load %arg3[%c0_3, %c0_4] : memref<128x128xf32, #tpu.memory_space<vmem>>, vector<128x128xf32>
    %cst_5 = arith.constant 9.99999974E-6 : f32
    %4 = vector.broadcast %cst_5 : f32 to vector<128x128xf32>
    %5 = arith.addf %2, %4 : vector<128x128xf32>
    %6 = arith.divf %3, %5 : vector<128x128xf32>
    %c0_6 = arith.constant 0 : index
    %c0_7 = arith.constant 0 : index
    %7 = vector.load %arg4[%c0_6, %c0_7] : memref<128x128xf32, #tpu.memory_space<vmem>>, vector<128x128xf32>
    tpu.vector_store %arg4[%c0_6, %c0_7], %6 {strides = array<i32>} : memref<128x128xf32, #tpu.memory_space<vmem>>, vector<128x128xf32>,
    return
  }
  func.func @transform_0(%arg0: i32) -> (i32, i32) {
    %c0_i32 = arith.constant 0 : i32
    %c0_i32_0 = arith.constant 0 : i32
    return %arg0, %c0_i32 : i32, i32
  }
  func.func @transform_1(%arg0: i32) -> (i32, i32) {
    %c0_i32 = arith.constant 0 : i32
    %c0_i32_0 = arith.constant 0 : i32
    %c0_i32_1 = arith.constant 0 : i32
    return %c0_i32, %c0_i32_0 : i32, i32
  }
  func.func @transform_2(%arg0: i32) -> (i32, i32) {
    %c0_i32 = arith.constant 0 : i32
    %c0_i32_0 = arith.constant 0 : i32
    return %arg0, %c0_i32 : i32, i32
  }
  func.func @transform_3(%arg0: i32) -> (i32, i32) {
    %c0_i32 = arith.constant 0 : i32
    %c0_i32_0 = arith.constant 0 : i32
    return %arg0, %c0_i32 : i32, i32
  }
}

</mosaic_0001>

<bundles_post_ra>
// kernel: relevance_propagation_basic_block.6
= control target key start
LH: loop header
LB: loop body
LE: loop exit
PB: predicated region body
PF: predicated region fallthrough
CT: control target
= control target key end

     0   :  { %v311_v16 = vlaneseq  ;;  %v451_v20 = vmov 0   ;;  %s658_s1 = inlined_call_operand.vmem [shape: bf16[128,128], index: 1, kind: input, shape index: {}]   ;;  %s659_s0 = inlined_call_operand.vmem [shape: bf16[128,128], index: 0, kind: input, shape index: {}]   ;;  %s660_s4 = inlined_call_operand.vmem [shape: f32[1,128], index: 4, kind: input, shape index: {}]   ;;  %s661_s2 = inlined_call_operand.vmem [shape: f32[1,128], index: 2, kind: input, shape index: {}]   ;;  %s662_s3 = inlined_call_operand.vmem [shape: f32[1,128], index: 3, kind: input, shape index: {}]   ;;  %s663_s5 = inlined_call_operand.vmem [shape: f32[128,128], index: 5, kind: output, shape index: {}]  }
   0x1   :  { %v435_v0 = vld [vmem:[%s658_s1] sm:$0xff]   ;;  %v436_v1 = vld [vmem:[%s658_s1 + $0x8] sm:$0xff]   ;;  %v437_v2 = vld [vmem:[%s658_s1 + $0x10] sm:$0xff]  }
   0x2   :  { %386 = vmatprep.subr.bf16.mxu0 %v435_v0  ;;  %418 = vmatprep.subr.bf16.mxu1 %v435_v0  ;;  %v438_v3 = vld [vmem:[%s658_s1 + $0x18] sm:$0xff]   ;;  %v443_v4 = vld [vmem:[%s659_s0] sm:$0xff]   ;;  %v440_v7 = vld [vmem:[%s658_s1 + $0x28] sm:$0xff]   ;;  %v312_v18 = vshrl.u32 %v311_v16, 7 }
   0x3   :  { %387 = vmatpush3.bf16.msra.mxu0 %v435_v0  ;;  %426 = vmatpush3.bf16.msra.mxu1 %v435_v0  ;;  %v444_v5 = vld [vmem:[%s659_s0 + $0x20] sm:$0xff]   ;;  %v441_v8 = vld [vmem:[%s658_s1 + $0x30] sm:$0xff]   ;;  %v442_v9 = vld [vmem:[%s658_s1 + $0x38] sm:$0xff]  }
   0x4   :  { %388 = vmatprep.subr.bf16.mxu0 %v436_v1  ;;  %419 = vmatprep.subr.bf16.mxu1 %v436_v1  ;;  %v439_v6 = vld [vmem:[%s658_s1 + $0x20] sm:$0xff]   ;;  %v445_v10 = vld [vmem:[%s659_s0 + $0x8] sm:$0xff]   ;;  %v447_v12 = vld [vmem:[%s659_s0 + $0x10] sm:$0xff]   ;;  %v313_v19 = vsub.s32 0, %v312_v18 }
   0x5   :  { %402 = vmatprep.mubr.bf16.mxu0 %v443_v4  ;;  %410 = vmatprep.mubr.bf16.mxu1 %v444_v5  ;;  %v446_v11 = vld [vmem:[%s659_s0 + $0x28] sm:$0xff]   ;;  %v448_v13 = vld [vmem:[%s659_s0 + $0x30] sm:$0xff]   ;;  %v449_v14 = vld [vmem:[%s659_s0 + $0x18] sm:$0xff]  }
   0x6   :  { %v450_v15 = vld [vmem:[%s659_s0 + $0x38] sm:$0xff]   ;;  %v292_v17 = vld [vmem:[%s660_s4] sm:$0x1] }
   0x7   :  { %389 = vmatpush3.bf16.msra.mxu0 %v436_v1  ;;  %427 = vmatpush3.bf16.msra.mxu1 %v436_v1  ;;  %vm293_vm0 = vcmp.gt.f32.partialorder %v292_v17, 0.0  ;;  %v536_v22 = vld [vmem:[%s661_s2] ss:$0 sm:$0xff] }
   0x8   :  { %390 = vmatprep.subr.bf16.mxu0 %v437_v2  ;;  %420 = vmatprep.subr.bf16.mxu1 %v437_v2  ;;  %v310_v21 = vsel %vm293_vm0, 1, %v451_v20  ;;  %v543_v25 = vld [vmem:[%s662_s3] ss:$0 sm:$0xff] }
   0x9   :  { %v538_v23 = vrot.slane %v310_v21, %v313_v19 }
   0xb   :  { %391 = vmatpush3.bf16.msra.mxu0 %v437_v2  ;;  %428 = vmatpush3.bf16.msra.mxu1 %v437_v2  ;;  %vm315_vm1 = vcmp.eq.s32.totalorder %v538_v23, 1 }
   0xc   :  { %392 = vmatprep.subr.bf16.mxu0 %v438_v3  ;;  %421 = vmatprep.subr.bf16.mxu1 %v438_v3 }
   0xf   :  { %393 = vmatpush3.bf16.msra.mxu0 %v438_v3  ;;  %429 = vmatpush3.bf16.msra.mxu1 %v438_v3 }
  0x10   :  { %394 = vmatprep.subr.bf16.mxu0 %v439_v6  ;;  %422 = vmatprep.subr.bf16.mxu1 %v439_v6 }
  0x13   :  { %395 = vmatpush3.bf16.msra.mxu0 %v439_v6  ;;  %430 = vmatpush3.bf16.msra.mxu1 %v439_v6 }
  0x14   :  { %396 = vmatprep.subr.bf16.mxu0 %v440_v7  ;;  %423 = vmatprep.subr.bf16.mxu1 %v440_v7 }
  0x17   :  { %397 = vmatpush3.bf16.msra.mxu0 %v440_v7  ;;  %431 = vmatpush3.bf16.msra.mxu1 %v440_v7 }
  0x18   :  { %398 = vmatprep.subr.bf16.mxu0 %v441_v8  ;;  %424 = vmatprep.subr.bf16.mxu1 %v441_v8 }
  0x1b   :  { %399 = vmatpush3.bf16.msra.mxu0 %v441_v8  ;;  %432 = vmatpush3.bf16.msra.mxu1 %v441_v8 }
  0x1c   :  { %400 = vmatprep.subr.bf16.mxu0 %v442_v9  ;;  %425 = vmatprep.subr.bf16.mxu1 %v442_v9 }
  0x1f   :  { %401 = vmatpush3.bf16.msra.mxu0 %v442_v9  ;;  %433 = vmatpush3.bf16.msra.mxu1 %v442_v9 }
  0x22   :  { %403 = vmatmul.mubr.bf16.vlgmr.msra.gmra.mrb[0].mxu0 %v445_v10  ;;  %411 = vmatmul.mubr.bf16.vlgmr.msra.gmra.mrb[0].mxu1 %v446_v11 }
  0x23   :  { %406 = vmatprep.mubr.bf16.mxu0 %v447_v12  ;;  %414 = vmatprep.mubr.bf16.mxu1 %v448_v13 }
  0x2a   :  { %407 = vmatmul.mubr.bf16.gmra.mrb[4].mxu0 %v449_v14  ;;  %415 = vmatmul.mubr.bf16.gmra.mrb[4].mxu1 %v450_v15 }
  0xf5   :  { %v404_v24 = vpop.f32.mrb[0].mxu0  ;;  %v412_v26 = vpop.f32.mrb[0].mxu1 }
  0xf6   :  { %v255_v27 = vmul.f32 %v404_v24, %v536_v22  ;;  %v263_v28 = vmul.f32 %v412_v26, %v536_v22  ;;  %v183_v29 = vpop.f32.mrb[1].mxu0  ;;  %v215_v30 = vpop.f32.mrb[1].mxu1 }
  0xf7   :  { %v253_v31 = vmul.f32 %v536_v22, %v183_v29  ;;  %v261_v32 = vmul.f32 %v536_v22, %v215_v30  ;;  %v405_v33 = vpop.f32.mrb[2].mxu0  ;;  %v413_v34 = vpop.f32.mrb[2].mxu1 }
  0xf8   :  { %v278_v35 = vadd.f32 %v543_v25, %v255_v27  ;;  %v286_v36 = vadd.f32 %v543_v25, %v263_v28  ;;  %v256_v37 = vmul.f32 %v405_v33, %v536_v22  ;;  %v264_v38 = vmul.f32 %v413_v34, %v536_v22  ;;  %v186_v39 = vpop.f32.mrb[3].mxu0  ;;  %v218_v40 = vpop.f32.mrb[3].mxu1 }
  0xf9   :  { %v276_v41 = vadd.f32 %v543_v25, %v253_v31  ;;  %v284_v42 = vadd.f32 %v543_v25, %v261_v32  ;;  %v254_v43 = vmul.f32 %v536_v22, %v186_v39  ;;  %v262_v44 = vmul.f32 %v536_v22, %v218_v40 }
  0xfa   :  { %v296_v45 = vmax.f32 %v278_v35, 0.0  ;;  %v304_v46 = vmax.f32 %v286_v36, 0.0  ;;  %v279_v47 = vadd.f32 %v543_v25, %v256_v37  ;;  %v287_v48 = vadd.f32 %v543_v25, %v264_v38 }
  0xfb   :  { %v294_v49 = vmax.f32 %v276_v41, 0.0  ;;  %v302_v50 = vmax.f32 %v284_v42, 0.0  ;;  %v277_v51 = vadd.f32 %v543_v25, %v254_v43  ;;  %v285_v52 = vadd.f32 %v543_v25, %v262_v44 }
  0xfc   :  { %v318_v53 = vsel %vm315_vm1, %v296_v45, %v278_v35  ;;  %v326_v54 = vsel %vm315_vm1, %v304_v46, %v286_v36  ;;  %v297_v55 = vmax.f32 %v279_v47, 0.0  ;;  %v305_v56 = vmax.f32 %v287_v48, 0.0 }
  0xfd   :  { %334 = vst [vmem:[%s663_s5 + $0x10] sm:$0xff] %v318_v53  ;;  %342 = vst [vmem:[%s663_s5 + $0x50] sm:$0xff] %v326_v54  ;;  %v316_v57 = vsel %vm315_vm1, %v294_v49, %v276_v41  ;;  %v324_v58 = vsel %vm315_vm1, %v302_v50, %v284_v42  ;;  %v295_v59 = vmax.f32 %v277_v51, 0.0  ;;  %v303_v60 = vmax.f32 %v285_v52, 0.0  ;;  %v408_v61 = vpop.f32.mrb[4].mxu0  ;;  %v416_v62 = vpop.f32.mrb[4].mxu1 }
  0xfe   :  { %332 = vst [vmem:[%s663_s5] sm:$0xff] %v316_v57  ;;  %340 = vst [vmem:[%s663_s5 + $0x40] sm:$0xff] %v324_v58  ;;  %v319_v63 = vsel %vm315_vm1, %v297_v55, %v279_v47  ;;  %v327_v0 = vsel %vm315_vm1, %v305_v56, %v287_v48  ;;  %v259_v1 = vmul.f32 %v408_v61, %v536_v22  ;;  %v199_v3 = vpop.f32.mrb[5].mxu0  ;;  %v231_v4 = vpop.f32.mrb[5].mxu1 }
  0xff   :  { %v267_v2 = vmul.f32 %v416_v62, %v536_v22  ;;  %335 = vst [vmem:[%s663_s5 + $0x18] sm:$0xff] %v319_v63  ;;  %343 = vst [vmem:[%s663_s5 + $0x58] sm:$0xff] %v327_v0  ;;  %v317_v5 = vsel %vm315_vm1, %v295_v59, %v277_v51  ;;  %v325_v6 = vsel %vm315_vm1, %v303_v60, %v285_v52  ;;  %v409_v9 = vpop.f32.mrb[6].mxu0  ;;  %v417_v10 = vpop.f32.mrb[6].mxu1 }
 0x100   :  { %v257_v7 = vmul.f32 %v536_v22, %v199_v3  ;;  %v265_v8 = vmul.f32 %v536_v22, %v231_v4  ;;  %333 = vst [vmem:[%s663_s5 + $0x8] sm:$0xff] %v317_v5  ;;  %341 = vst [vmem:[%s663_s5 + $0x48] sm:$0xff] %v325_v6  ;;  %v282_v11 = vadd.f32 %v543_v25, %v259_v1  ;;  %v202_v15 = vpop.f32.mrb[7].mxu0  ;;  %v234_v16 = vpop.f32.mrb[7].mxu1 }
 0x101   :  { %v290_v12 = vadd.f32 %v543_v25, %v267_v2  ;;  %v260_v13 = vmul.f32 %v409_v9, %v536_v22  ;;  %v268_v14 = vmul.f32 %v417_v10, %v536_v22  ;;  %v258_v19 = vmul.f32 %v536_v22, %v202_v15 }
 0x102   :  { %v280_v17 = vadd.f32 %v543_v25, %v257_v7  ;;  %v288_v18 = vadd.f32 %v543_v25, %v265_v8  ;;  %v266_v20 = vmul.f32 %v536_v22, %v234_v16  ;;  %v300_v21 = vmax.f32 %v282_v11, 0.0 }
 0x103   :  { %v308_v24 = vmax.f32 %v290_v12, 0.0  ;;  %v283_v26 = vadd.f32 %v543_v25, %v260_v13  ;;  %v291_v27 = vadd.f32 %v543_v25, %v268_v14  ;;  %v281_v30 = vadd.f32 %v543_v25, %v258_v19 }
 0x104   :  { %v298_v28 = vmax.f32 %v280_v17, 0.0  ;;  %v306_v29 = vmax.f32 %v288_v18, 0.0  ;;  %v289_v31 = vadd.f32 %v543_v25, %v266_v20  ;;  %v322_v32 = vsel %vm315_vm1, %v300_v21, %v282_v11 }
 0x105   :  { %v330_v33 = vsel %vm315_vm1, %v308_v24, %v290_v12  ;;  %v301_v34 = vmax.f32 %v283_v26, 0.0  ;;  %v309_v22 = vmax.f32 %v291_v27, 0.0  ;;  %338 = vst [vmem:[%s663_s5 + $0x30] sm:$0xff] %v322_v32  ;;  %v299_v36 = vmax.f32 %v281_v30, 0.0 }
 0x106   :  { %346 = vst [vmem:[%s663_s5 + $0x70] sm:$0xff] %v330_v33  ;;  %v320_v35 = vsel %vm315_vm1, %v298_v28, %v280_v17  ;;  %v328_v25 = vsel %vm315_vm1, %v306_v29, %v288_v18  ;;  %v307_v37 = vmax.f32 %v289_v31, 0.0 }
 0x107   :  { %336 = vst [vmem:[%s663_s5 + $0x20] sm:$0xff] %v320_v35  ;;  %344 = vst [vmem:[%s663_s5 + $0x60] sm:$0xff] %v328_v25  ;;  %v323_v38 = vsel %vm315_vm1, %v301_v34, %v283_v26  ;;  %v331_v39 = vsel %vm315_vm1, %v309_v22, %v291_v27  ;;  %v321_v40 = vsel %vm315_vm1, %v299_v36, %v281_v30 }
 0x108   :  { %339 = vst [vmem:[%s663_s5 + $0x38] sm:$0xff] %v323_v38  ;;  %347 = vst [vmem:[%s663_s5 + $0x78] sm:$0xff] %v331_v39  ;;  %v329_v41 = vsel %vm315_vm1, %v307_v37, %v289_v31 }
 0x109   :  { %337 = vst [vmem:[%s663_s5 + $0x28] sm:$0xff] %v321_v40  ;;  %345 = vst [vmem:[%s663_s5 + $0x68] sm:$0xff] %v329_v41 }

// kernel: relevance_propagation_basic_block.7
= control target key start
LH: loop header
LB: loop body
LE: loop exit
PB: predicated region body
PF: predicated region fallthrough
CT: control target
= control target key end

     0   :  { %s534_s1 = inlined_call_operand.vmem [shape: bf16[128,128], index: 1, kind: input, shape index: {}]   ;;  %s535_s0 = inlined_call_operand.vmem [shape: bf16[128,128], index: 0, kind: input, shape index: {}]   ;;  %s536_s2 = inlined_call_operand.vmem [shape: f32[1,128], index: 2, kind: input, shape index: {}]   ;;  %s537_s3 = inlined_call_operand.vmem [shape: f32[1,128], index: 3, kind: input, shape index: {}]   ;;  %s538_s4 = inlined_call_operand.vmem [shape: f32[128,128], index: 4, kind: output, shape index: {}]  }
   0x1   :  { %v391_v0 = vld [vmem:[%s534_s1] sm:$0xff]   ;;  %v392_v1 = vld [vmem:[%s534_s1 + $0x8] sm:$0xff]   ;;  %v393_v2 = vld [vmem:[%s534_s1 + $0x10] sm:$0xff]  }
   0x2   :  { %343 = vmatprep.subr.bf16.mxu0 %v391_v0  ;;  %375 = vmatprep.subr.bf16.mxu1 %v391_v0  ;;  %v394_v3 = vld [vmem:[%s534_s1 + $0x18] sm:$0xff]   ;;  %v399_v4 = vld [vmem:[%s535_s0] sm:$0xff]   ;;  %v396_v7 = vld [vmem:[%s534_s1 + $0x28] sm:$0xff]  }
   0x3   :  { %344 = vmatpush3.bf16.msra.mxu0 %v391_v0  ;;  %383 = vmatpush3.bf16.msra.mxu1 %v391_v0  ;;  %v400_v5 = vld [vmem:[%s535_s0 + $0x20] sm:$0xff]   ;;  %v397_v8 = vld [vmem:[%s534_s1 + $0x30] sm:$0xff]   ;;  %v398_v9 = vld [vmem:[%s534_s1 + $0x38] sm:$0xff]  }
   0x4   :  { %345 = vmatprep.subr.bf16.mxu0 %v392_v1  ;;  %376 = vmatprep.subr.bf16.mxu1 %v392_v1  ;;  %v395_v6 = vld [vmem:[%s534_s1 + $0x20] sm:$0xff]   ;;  %v401_v10 = vld [vmem:[%s535_s0 + $0x8] sm:$0xff]   ;;  %v403_v12 = vld [vmem:[%s535_s0 + $0x10] sm:$0xff]  }
   0x5   :  { %359 = vmatprep.mubr.bf16.mxu0 %v399_v4  ;;  %367 = vmatprep.mubr.bf16.mxu1 %v400_v5  ;;  %v402_v11 = vld [vmem:[%s535_s0 + $0x28] sm:$0xff]   ;;  %v404_v13 = vld [vmem:[%s535_s0 + $0x30] sm:$0xff]   ;;  %v405_v14 = vld [vmem:[%s535_s0 + $0x18] sm:$0xff]  }
   0x6   :  { %v406_v15 = vld [vmem:[%s535_s0 + $0x38] sm:$0xff]   ;;  %v325_v16 = vld [vmem:[%s536_s2] ss:$0 sm:$0xff] }
   0x7   :  { %346 = vmatpush3.bf16.msra.mxu0 %v392_v1  ;;  %384 = vmatpush3.bf16.msra.mxu1 %v392_v1  ;;  %v326_v18 = vld [vmem:[%s537_s3] ss:$0 sm:$0xff] }
   0x8   :  { %347 = vmatprep.subr.bf16.mxu0 %v393_v2  ;;  %377 = vmatprep.subr.bf16.mxu1 %v393_v2 }
   0xb   :  { %348 = vmatpush3.bf16.msra.mxu0 %v393_v2  ;;  %385 = vmatpush3.bf16.msra.mxu1 %v393_v2 }
   0xc   :  { %349 = vmatprep.subr.bf16.mxu0 %v394_v3  ;;  %378 = vmatprep.subr.bf16.mxu1 %v394_v3 }
   0xf   :  { %350 = vmatpush3.bf16.msra.mxu0 %v394_v3  ;;  %386 = vmatpush3.bf16.msra.mxu1 %v394_v3 }
  0x10   :  { %351 = vmatprep.subr.bf16.mxu0 %v395_v6  ;;  %379 = vmatprep.subr.bf16.mxu1 %v395_v6 }
  0x13   :  { %352 = vmatpush3.bf16.msra.mxu0 %v395_v6  ;;  %387 = vmatpush3.bf16.msra.mxu1 %v395_v6 }
  0x14   :  { %353 = vmatprep.subr.bf16.mxu0 %v396_v7  ;;  %380 = vmatprep.subr.bf16.mxu1 %v396_v7 }
  0x17   :  { %354 = vmatpush3.bf16.msra.mxu0 %v396_v7  ;;  %388 = vmatpush3.bf16.msra.mxu1 %v396_v7 }
  0x18   :  { %355 = vmatprep.subr.bf16.mxu0 %v397_v8  ;;  %381 = vmatprep.subr.bf16.mxu1 %v397_v8 }
  0x1b   :  { %356 = vmatpush3.bf16.msra.mxu0 %v397_v8  ;;  %389 = vmatpush3.bf16.msra.mxu1 %v397_v8 }
  0x1c   :  { %357 = vmatprep.subr.bf16.mxu0 %v398_v9  ;;  %382 = vmatprep.subr.bf16.mxu1 %v398_v9 }
  0x1f   :  { %358 = vmatpush3.bf16.msra.mxu0 %v398_v9  ;;  %390 = vmatpush3.bf16.msra.mxu1 %v398_v9 }
  0x22   :  { %360 = vmatmul.mubr.bf16.vlgmr.msra.gmra.mrb[0].mxu0 %v401_v10  ;;  %368 = vmatmul.mubr.bf16.vlgmr.msra.gmra.mrb[0].mxu1 %v402_v11 }
  0x23   :  { %363 = vmatprep.mubr.bf16.mxu0 %v403_v12  ;;  %371 = vmatprep.mubr.bf16.mxu1 %v404_v13 }
  0x2a   :  { %364 = vmatmul.mubr.bf16.gmra.mrb[4].mxu0 %v405_v14  ;;  %372 = vmatmul.mubr.bf16.gmra.mrb[4].mxu1 %v406_v15 }
  0xf5   :  { %v361_v17 = vpop.f32.mrb[0].mxu0  ;;  %v369_v19 = vpop.f32.mrb[0].mxu1 }
  0xf6   :  { %v252_v20 = vmul.f32 %v361_v17, %v325_v16  ;;  %v260_v21 = vmul.f32 %v369_v19, %v325_v16  ;;  %v180_v22 = vpop.f32.mrb[1].mxu0  ;;  %v212_v23 = vpop.f32.mrb[1].mxu1 }
  0xf7   :  { %v250_v24 = vmul.f32 %v325_v16, %v180_v22  ;;  %v258_v25 = vmul.f32 %v325_v16, %v212_v23  ;;  %v362_v26 = vpop.f32.mrb[2].mxu0  ;;  %v370_v27 = vpop.f32.mrb[2].mxu1 }
  0xf8   :  { %v275_v28 = vadd.f32 %v326_v18, %v252_v20  ;;  %v283_v29 = vadd.f32 %v326_v18, %v260_v21  ;;  %v253_v30 = vmul.f32 %v362_v26, %v325_v16  ;;  %v261_v31 = vmul.f32 %v370_v27, %v325_v16  ;;  %v183_v32 = vpop.f32.mrb[3].mxu0  ;;  %v215_v33 = vpop.f32.mrb[3].mxu1 }
  0xf9   :  { %v273_v34 = vadd.f32 %v326_v18, %v250_v24  ;;  %v281_v35 = vadd.f32 %v326_v18, %v258_v25  ;;  %v251_v36 = vmul.f32 %v325_v16, %v183_v32  ;;  %v259_v37 = vmul.f32 %v325_v16, %v215_v33 }
  0xfa   :  { %291 = vst [vmem:[%s538_s4 + $0x10] sm:$0xff] %v275_v28  ;;  %299 = vst [vmem:[%s538_s4 + $0x50] sm:$0xff] %v283_v29  ;;  %v276_v38 = vadd.f32 %v326_v18, %v253_v30  ;;  %v284_v39 = vadd.f32 %v326_v18, %v261_v31 }
  0xfb   :  { %289 = vst [vmem:[%s538_s4] sm:$0xff] %v273_v34  ;;  %297 = vst [vmem:[%s538_s4 + $0x40] sm:$0xff] %v281_v35  ;;  %v274_v40 = vadd.f32 %v326_v18, %v251_v36  ;;  %v282_v41 = vadd.f32 %v326_v18, %v259_v37 }
  0xfc   :  { %292 = vst [vmem:[%s538_s4 + $0x18] sm:$0xff] %v276_v38  ;;  %300 = vst [vmem:[%s538_s4 + $0x58] sm:$0xff] %v284_v39 }
  0xfd   :  { %290 = vst [vmem:[%s538_s4 + $0x8] sm:$0xff] %v274_v40  ;;  %298 = vst [vmem:[%s538_s4 + $0x48] sm:$0xff] %v282_v41  ;;  %v365_v42 = vpop.f32.mrb[4].mxu0  ;;  %v373_v43 = vpop.f32.mrb[4].mxu1 }
  0xfe   :  { %v256_v44 = vmul.f32 %v365_v42, %v325_v16  ;;  %v264_v45 = vmul.f32 %v373_v43, %v325_v16  ;;  %v196_v46 = vpop.f32.mrb[5].mxu0  ;;  %v228_v47 = vpop.f32.mrb[5].mxu1 }
  0xff   :  { %v254_v48 = vmul.f32 %v325_v16, %v196_v46  ;;  %v262_v49 = vmul.f32 %v325_v16, %v228_v47  ;;  %v366_v50 = vpop.f32.mrb[6].mxu0  ;;  %v374_v51 = vpop.f32.mrb[6].mxu1 }
 0x100   :  { %v279_v52 = vadd.f32 %v326_v18, %v256_v44  ;;  %v287_v53 = vadd.f32 %v326_v18, %v264_v45  ;;  %v257_v54 = vmul.f32 %v366_v50, %v325_v16  ;;  %v265_v55 = vmul.f32 %v374_v51, %v325_v16  ;;  %v199_v56 = vpop.f32.mrb[7].mxu0  ;;  %v231_v57 = vpop.f32.mrb[7].mxu1 }
 0x101   :  { %v277_v58 = vadd.f32 %v326_v18, %v254_v48  ;;  %v285_v59 = vadd.f32 %v326_v18, %v262_v49  ;;  %v255_v60 = vmul.f32 %v325_v16, %v199_v56  ;;  %v263_v61 = vmul.f32 %v325_v16, %v231_v57 }
 0x102   :  { %295 = vst [vmem:[%s538_s4 + $0x30] sm:$0xff] %v279_v52  ;;  %303 = vst [vmem:[%s538_s4 + $0x70] sm:$0xff] %v287_v53  ;;  %v280_v62 = vadd.f32 %v326_v18, %v257_v54  ;;  %v288_v63 = vadd.f32 %v326_v18, %v265_v55 }
 0x103   :  { %293 = vst [vmem:[%s538_s4 + $0x20] sm:$0xff] %v277_v58  ;;  %301 = vst [vmem:[%s538_s4 + $0x60] sm:$0xff] %v285_v59  ;;  %v278_v0 = vadd.f32 %v326_v18, %v255_v60  ;;  %v286_v1 = vadd.f32 %v326_v18, %v263_v61 }
 0x104   :  { %296 = vst [vmem:[%s538_s4 + $0x38] sm:$0xff] %v280_v62  ;;  %304 = vst [vmem:[%s538_s4 + $0x78] sm:$0xff] %v288_v63 }
 0x105   :  { %294 = vst [vmem:[%s538_s4 + $0x28] sm:$0xff] %v278_v0  ;;  %302 = vst [vmem:[%s538_s4 + $0x68] sm:$0xff] %v286_v1 }

// kernel: relevance_propagation_basic_block.9
= control target key start
LH: loop header
LB: loop body
LE: loop exit
PB: predicated region body
PF: predicated region fallthrough
CT: control target
= control target key end

     0   :  { %s552_s1 = inlined_call_operand.vmem [shape: bf16[128,128], index: 1, kind: input, shape index: {}]   ;;  %s553_s0 = inlined_call_operand.vmem [shape: bf16[128,128], index: 0, kind: input, shape index: {}]   ;;  %s554_s2 = inlined_call_operand.vmem [shape: f32[128,128], index: 2, kind: input, shape index: {}]   ;;  %s555_s3 = inlined_call_operand.vmem [shape: f32[128,128], index: 3, kind: output, shape index: {}]  }
   0x1   :  { %v372_v0 = vld [vmem:[%s552_s1] sm:$0xff]   ;;  %v373_v1 = vld [vmem:[%s552_s1 + $0x8] sm:$0xff]   ;;  %v374_v2 = vld [vmem:[%s552_s1 + $0x10] sm:$0xff]  }
   0x2   :  { %324 = vmatprep.subr.bf16.mxu0 %v372_v0  ;;  %356 = vmatprep.subr.bf16.mxu1 %v372_v0  ;;  %v375_v3 = vld [vmem:[%s552_s1 + $0x18] sm:$0xff]   ;;  %v380_v4 = vld [vmem:[%s553_s0] sm:$0xff]   ;;  %v377_v7 = vld [vmem:[%s552_s1 + $0x28] sm:$0xff]  }
   0x3   :  { %325 = vmatpush3.bf16.msra.mxu0 %v372_v0  ;;  %364 = vmatpush3.bf16.msra.mxu1 %v372_v0  ;;  %v381_v5 = vld [vmem:[%s553_s0 + $0x20] sm:$0xff]   ;;  %v378_v8 = vld [vmem:[%s552_s1 + $0x30] sm:$0xff]   ;;  %v379_v9 = vld [vmem:[%s552_s1 + $0x38] sm:$0xff]  }
   0x4   :  { %326 = vmatprep.subr.bf16.mxu0 %v373_v1  ;;  %357 = vmatprep.subr.bf16.mxu1 %v373_v1  ;;  %v376_v6 = vld [vmem:[%s552_s1 + $0x20] sm:$0xff]   ;;  %v382_v10 = vld [vmem:[%s553_s0 + $0x8] sm:$0xff]   ;;  %v384_v12 = vld [vmem:[%s553_s0 + $0x10] sm:$0xff]  }
   0x5   :  { %340 = vmatprep.mubr.bf16.mxu0 %v380_v4  ;;  %348 = vmatprep.mubr.bf16.mxu1 %v381_v5  ;;  %v383_v11 = vld [vmem:[%s553_s0 + $0x28] sm:$0xff]   ;;  %v385_v13 = vld [vmem:[%s553_s0 + $0x30] sm:$0xff]   ;;  %v386_v14 = vld [vmem:[%s553_s0 + $0x18] sm:$0xff]  }
   0x6   :  { %v387_v15 = vld [vmem:[%s553_s0 + $0x38] sm:$0xff]   ;;  %v242_v16 = vld [vmem:[%s554_s2 + $0x10] sm:$0xff]  ;;  %v240_v18 = vld [vmem:[%s554_s2] sm:$0xff] }
   0x7   :  { %327 = vmatpush3.bf16.msra.mxu0 %v373_v1  ;;  %365 = vmatpush3.bf16.msra.mxu1 %v373_v1  ;;  %v250_v17 = vld [vmem:[%s554_s2 + $0x50] sm:$0xff]  ;;  %v248_v19 = vld [vmem:[%s554_s2 + $0x40] sm:$0xff]  ;;  %v243_v22 = vld [vmem:[%s554_s2 + $0x18] sm:$0xff] }
   0x8   :  { %328 = vmatprep.subr.bf16.mxu0 %v374_v2  ;;  %358 = vmatprep.subr.bf16.mxu1 %v374_v2  ;;  %v251_v23 = vld [vmem:[%s554_s2 + $0x58] sm:$0xff]  ;;  %v241_v28 = vld [vmem:[%s554_s2 + $0x8] sm:$0xff]  ;;  %v246_v40 = vld [vmem:[%s554_s2 + $0x30] sm:$0xff] }
   0x9   :  { %v249_v29 = vld [vmem:[%s554_s2 + $0x48] sm:$0xff]  ;;  %v254_v41 = vld [vmem:[%s554_s2 + $0x70] sm:$0xff]  ;;  %v244_v42 = vld [vmem:[%s554_s2 + $0x20] sm:$0xff] }
   0xa   :  { %v252_v43 = vld [vmem:[%s554_s2 + $0x60] sm:$0xff]  ;;  %v247_v46 = vld [vmem:[%s554_s2 + $0x38] sm:$0xff]  ;;  %v245_v52 = vld [vmem:[%s554_s2 + $0x28] sm:$0xff] }
   0xb   :  { %329 = vmatpush3.bf16.msra.mxu0 %v374_v2  ;;  %366 = vmatpush3.bf16.msra.mxu1 %v374_v2  ;;  %v255_v47 = vld [vmem:[%s554_s2 + $0x78] sm:$0xff]  ;;  %v253_v53 = vld [vmem:[%s554_s2 + $0x68] sm:$0xff] }
   0xc   :  { %330 = vmatprep.subr.bf16.mxu0 %v375_v3  ;;  %359 = vmatprep.subr.bf16.mxu1 %v375_v3 }
   0xf   :  { %331 = vmatpush3.bf16.msra.mxu0 %v375_v3  ;;  %367 = vmatpush3.bf16.msra.mxu1 %v375_v3 }
  0x10   :  { %332 = vmatprep.subr.bf16.mxu0 %v376_v6  ;;  %360 = vmatprep.subr.bf16.mxu1 %v376_v6 }
  0x13   :  { %333 = vmatpush3.bf16.msra.mxu0 %v376_v6  ;;  %368 = vmatpush3.bf16.msra.mxu1 %v376_v6 }
  0x14   :  { %334 = vmatprep.subr.bf16.mxu0 %v377_v7  ;;  %361 = vmatprep.subr.bf16.mxu1 %v377_v7 }
  0x17   :  { %335 = vmatpush3.bf16.msra.mxu0 %v377_v7  ;;  %369 = vmatpush3.bf16.msra.mxu1 %v377_v7 }
  0x18   :  { %336 = vmatprep.subr.bf16.mxu0 %v378_v8  ;;  %362 = vmatprep.subr.bf16.mxu1 %v378_v8 }
  0x1b   :  { %337 = vmatpush3.bf16.msra.mxu0 %v378_v8  ;;  %370 = vmatpush3.bf16.msra.mxu1 %v378_v8 }
  0x1c   :  { %338 = vmatprep.subr.bf16.mxu0 %v379_v9  ;;  %363 = vmatprep.subr.bf16.mxu1 %v379_v9 }
  0x1f   :  { %339 = vmatpush3.bf16.msra.mxu0 %v379_v9  ;;  %371 = vmatpush3.bf16.msra.mxu1 %v379_v9 }
  0x22   :  { %341 = vmatmul.mubr.bf16.vlgmr.msra.gmra.mrb[0].mxu0 %v382_v10  ;;  %349 = vmatmul.mubr.bf16.vlgmr.msra.gmra.mrb[0].mxu1 %v383_v11 }
  0x23   :  { %344 = vmatprep.mubr.bf16.mxu0 %v384_v12  ;;  %352 = vmatprep.mubr.bf16.mxu1 %v385_v13 }
  0x2a   :  { %345 = vmatmul.mubr.bf16.gmra.mrb[4].mxu0 %v386_v14  ;;  %353 = vmatmul.mubr.bf16.gmra.mrb[4].mxu1 %v387_v15 }
  0xf5   :  { %v342_v20 = vpop.f32.mrb[0].mxu0  ;;  %v350_v21 = vpop.f32.mrb[0].mxu1 }
  0xf6   :  { %v258_v24 = vmul.f32 %v342_v20, %v242_v16  ;;  %v266_v25 = vmul.f32 %v350_v21, %v250_v17  ;;  %v177_v26 = vpop.f32.mrb[1].mxu0  ;;  %v209_v27 = vpop.f32.mrb[1].mxu1 }
  0xf7   :  { %v256_v30 = vmul.f32 %v240_v18, %v177_v26  ;;  %v264_v31 = vmul.f32 %v248_v19, %v209_v27  ;;  %v343_v32 = vpop.f32.mrb[2].mxu0  ;;  %v351_v33 = vpop.f32.mrb[2].mxu1 }
  0xf8   :  { %274 = vst [vmem:[%s555_s3 + $0x10] sm:$0xff] %v258_v24  ;;  %282 = vst [vmem:[%s555_s3 + $0x50] sm:$0xff] %v266_v25  ;;  %v259_v34 = vmul.f32 %v343_v32, %v243_v22  ;;  %v267_v35 = vmul.f32 %v351_v33, %v251_v23  ;;  %v180_v36 = vpop.f32.mrb[3].mxu0  ;;  %v212_v37 = vpop.f32.mrb[3].mxu1 }
  0xf9   :  { %272 = vst [vmem:[%s555_s3] sm:$0xff] %v256_v30  ;;  %280 = vst [vmem:[%s555_s3 + $0x40] sm:$0xff] %v264_v31  ;;  %v257_v38 = vmul.f32 %v241_v28, %v180_v36  ;;  %v265_v39 = vmul.f32 %v249_v29, %v212_v37 }
  0xfa   :  { %275 = vst [vmem:[%s555_s3 + $0x18] sm:$0xff] %v259_v34  ;;  %283 = vst [vmem:[%s555_s3 + $0x58] sm:$0xff] %v267_v35 }
  0xfb   :  { %273 = vst [vmem:[%s555_s3 + $0x8] sm:$0xff] %v257_v38  ;;  %281 = vst [vmem:[%s555_s3 + $0x48] sm:$0xff] %v265_v39 }
  0xfd   :  { %v346_v44 = vpop.f32.mrb[4].mxu0  ;;  %v354_v45 = vpop.f32.mrb[4].mxu1 }
  0xfe   :  { %v262_v48 = vmul.f32 %v346_v44, %v246_v40  ;;  %v270_v49 = vmul.f32 %v354_v45, %v254_v41  ;;  %v193_v50 = vpop.f32.mrb[5].mxu0  ;;  %v225_v51 = vpop.f32.mrb[5].mxu1 }
  0xff   :  { %v260_v54 = vmul.f32 %v244_v42, %v193_v50  ;;  %v268_v55 = vmul.f32 %v252_v43, %v225_v51  ;;  %v347_v56 = vpop.f32.mrb[6].mxu0  ;;  %v355_v57 = vpop.f32.mrb[6].mxu1 }
 0x100   :  { %278 = vst [vmem:[%s555_s3 + $0x30] sm:$0xff] %v262_v48  ;;  %286 = vst [vmem:[%s555_s3 + $0x70] sm:$0xff] %v270_v49  ;;  %v263_v58 = vmul.f32 %v347_v56, %v247_v46  ;;  %v271_v59 = vmul.f32 %v355_v57, %v255_v47  ;;  %v196_v60 = vpop.f32.mrb[7].mxu0  ;;  %v228_v61 = vpop.f32.mrb[7].mxu1 }
 0x101   :  { %276 = vst [vmem:[%s555_s3 + $0x20] sm:$0xff] %v260_v54  ;;  %284 = vst [vmem:[%s555_s3 + $0x60] sm:$0xff] %v268_v55  ;;  %v261_v62 = vmul.f32 %v245_v52, %v196_v60  ;;  %v269_v63 = vmul.f32 %v253_v53, %v228_v61 }
 0x102   :  { %279 = vst [vmem:[%s555_s3 + $0x38] sm:$0xff] %v263_v58  ;;  %287 = vst [vmem:[%s555_s3 + $0x78] sm:$0xff] %v271_v59 }
 0x103   :  { %277 = vst [vmem:[%s555_s3 + $0x28] sm:$0xff] %v261_v62  ;;  %285 = vst [vmem:[%s555_s3 + $0x68] sm:$0xff] %v269_v63 }

// kernel: relevance_propagation_basic_block.8
= control target key start
LH: loop header
LB: loop body
LE: loop exit
PB: predicated region body
PF: predicated region fallthrough
CT: control target
= control target key end

     0   :  { %s600_s1 = inlined_call_operand.vmem [shape: bf16[128,128], index: 1, kind: input, shape index: {}]   ;;  %s601_s0 = inlined_call_operand.vmem [shape: bf16[128,128], index: 0, kind: input, shape index: {}]   ;;  %s602_s2 = inlined_call_operand.vmem [shape: f32[128,128], index: 2, kind: input, shape index: {}]   ;;  %s603_s3 = inlined_call_operand.vmem [shape: f32[128,128], index: 3, kind: output, shape index: {}]  }
   0x1   :  { %v388_v0 = vld [vmem:[%s600_s1] sm:$0xff]   ;;  %v389_v1 = vld [vmem:[%s600_s1 + $0x8] sm:$0xff]   ;;  %v390_v2 = vld [vmem:[%s600_s1 + $0x10] sm:$0xff]  }
   0x2   :  { %340 = vmatprep.subr.bf16.mxu0 %v388_v0  ;;  %372 = vmatprep.subr.bf16.mxu1 %v388_v0  ;;  %v391_v3 = vld [vmem:[%s600_s1 + $0x18] sm:$0xff]   ;;  %v396_v4 = vld [vmem:[%s601_s0] sm:$0xff]   ;;  %v393_v7 = vld [vmem:[%s600_s1 + $0x28] sm:$0xff]  }
   0x3   :  { %341 = vmatpush3.bf16.msra.mxu0 %v388_v0  ;;  %380 = vmatpush3.bf16.msra.mxu1 %v388_v0  ;;  %v397_v5 = vld [vmem:[%s601_s0 + $0x20] sm:$0xff]   ;;  %v394_v8 = vld [vmem:[%s600_s1 + $0x30] sm:$0xff]   ;;  %v395_v9 = vld [vmem:[%s600_s1 + $0x38] sm:$0xff]  }
   0x4   :  { %342 = vmatprep.subr.bf16.mxu0 %v389_v1  ;;  %373 = vmatprep.subr.bf16.mxu1 %v389_v1  ;;  %v392_v6 = vld [vmem:[%s600_s1 + $0x20] sm:$0xff]   ;;  %v398_v10 = vld [vmem:[%s601_s0 + $0x8] sm:$0xff]   ;;  %v400_v12 = vld [vmem:[%s601_s0 + $0x10] sm:$0xff]  }
   0x5   :  { %356 = vmatprep.mubr.bf16.mxu0 %v396_v4  ;;  %364 = vmatprep.mubr.bf16.mxu1 %v397_v5  ;;  %v399_v11 = vld [vmem:[%s601_s0 + $0x28] sm:$0xff]   ;;  %v401_v13 = vld [vmem:[%s601_s0 + $0x30] sm:$0xff]   ;;  %v402_v14 = vld [vmem:[%s601_s0 + $0x18] sm:$0xff]  }
   0x6   :  { %v403_v15 = vld [vmem:[%s601_s0 + $0x38] sm:$0xff]   ;;  %v49_v42 = vld [vmem:[%s602_s2 + $0x10] sm:$0xff]  ;;  %v47_v49 = vld [vmem:[%s602_s2] sm:$0xff] }
   0x7   :  { %343 = vmatpush3.bf16.msra.mxu0 %v389_v1  ;;  %381 = vmatpush3.bf16.msra.mxu1 %v389_v1  ;;  %v57_v46 = vld [vmem:[%s602_s2 + $0x50] sm:$0xff]  ;;  %v55_v53 = vld [vmem:[%s602_s2 + $0x40] sm:$0xff]  ;;  %v50_v57 = vld [vmem:[%s602_s2 + $0x18] sm:$0xff] }
   0x8   :  { %344 = vmatprep.subr.bf16.mxu0 %v390_v2  ;;  %374 = vmatprep.subr.bf16.mxu1 %v390_v2  ;;  %v58_v60 = vld [vmem:[%s602_s2 + $0x58] sm:$0xff]  ;;  %v48_v63 = vld [vmem:[%s602_s2 + $0x8] sm:$0xff]  ;;  %v53_v5 = vld [vmem:[%s602_s2 + $0x30] sm:$0xff] }
   0xb   :  { %345 = vmatpush3.bf16.msra.mxu0 %v390_v2  ;;  %382 = vmatpush3.bf16.msra.mxu1 %v390_v2  ;;  %v56_v2 = vld [vmem:[%s602_s2 + $0x48] sm:$0xff] }
   0xc   :  { %346 = vmatprep.subr.bf16.mxu0 %v391_v3  ;;  %375 = vmatprep.subr.bf16.mxu1 %v391_v3 }
   0xf   :  { %347 = vmatpush3.bf16.msra.mxu0 %v391_v3  ;;  %383 = vmatpush3.bf16.msra.mxu1 %v391_v3 }
  0x10   :  { %348 = vmatprep.subr.bf16.mxu0 %v392_v6  ;;  %376 = vmatprep.subr.bf16.mxu1 %v392_v6 }
  0x13   :  { %349 = vmatpush3.bf16.msra.mxu0 %v392_v6  ;;  %384 = vmatpush3.bf16.msra.mxu1 %v392_v6 }
  0x14   :  { %350 = vmatprep.subr.bf16.mxu0 %v393_v7  ;;  %377 = vmatprep.subr.bf16.mxu1 %v393_v7 }
  0x17   :  { %351 = vmatpush3.bf16.msra.mxu0 %v393_v7  ;;  %385 = vmatpush3.bf16.msra.mxu1 %v393_v7 }
  0x18   :  { %352 = vmatprep.subr.bf16.mxu0 %v394_v8  ;;  %378 = vmatprep.subr.bf16.mxu1 %v394_v8 }
  0x1b   :  { %353 = vmatpush3.bf16.msra.mxu0 %v394_v8  ;;  %386 = vmatpush3.bf16.msra.mxu1 %v394_v8  ;;  %v61_v8 = vld [vmem:[%s602_s2 + $0x70] sm:$0xff] }
  0x1c   :  { %354 = vmatprep.subr.bf16.mxu0 %v395_v9  ;;  %379 = vmatprep.subr.bf16.mxu1 %v395_v9 }
  0x1f   :  { %355 = vmatpush3.bf16.msra.mxu0 %v395_v9  ;;  %387 = vmatpush3.bf16.msra.mxu1 %v395_v9 }
  0x22   :  { %357 = vmatmul.mubr.bf16.vlgmr.msra.gmra.mrb[0].mxu0 %v398_v10  ;;  %365 = vmatmul.mubr.bf16.vlgmr.msra.gmra.mrb[0].mxu1 %v399_v11  ;;  %v51_v11 = vld [vmem:[%s602_s2 + $0x20] sm:$0xff] }
  0x23   :  { %360 = vmatprep.mubr.bf16.mxu0 %v400_v12  ;;  %368 = vmatprep.mubr.bf16.mxu1 %v401_v13 }
  0x2a   :  { %361 = vmatmul.mubr.bf16.gmra.mrb[4].mxu0 %v402_v14  ;;  %369 = vmatmul.mubr.bf16.gmra.mrb[4].mxu1 %v403_v15  ;;  %v59_v14 = vld [vmem:[%s602_s2 + $0x60] sm:$0xff] }
  0xf5   :  { %v358_v16 = vpop.f32.mrb[0].mxu0  ;;  %v366_v17 = vpop.f32.mrb[0].mxu1 }
  0xf6   :  { %v202_v18 = vadd.f32 1e-05, %v358_v16  ;;  %v234_v19 = vadd.f32 1e-05, %v366_v17  ;;  %v193_v20 = vpop.f32.mrb[1].mxu0  ;;  %v225_v21 = vpop.f32.mrb[1].mxu1 }
  0xf7   :  { %v194_v22 = vadd.f32 1e-05, %v193_v20  ;;  %v226_v23 = vadd.f32 1e-05, %v225_v21  ;;  %v359_v24 = vpop.f32.mrb[2].mxu0  ;;  %v367_v25 = vpop.f32.mrb[2].mxu1 }
  0xf8   :  { %404 = vrcp.f32 %v202_v18  ;;  %v205_v26 = vadd.f32 1e-05, %v359_v24  ;;  %v196_v27 = vpop.f32.mrb[3].mxu0  ;;  %v228_v28 = vpop.f32.mrb[3].mxu1  ;;  %v237_v29 = vadd.f32 1e-05, %v367_v25 }
  0xf9   :  { %406 = vrcp.f32 %v234_v19  ;;  %v197_v30 = vadd.f32 1e-05, %v196_v27  ;;  %v229_v31 = vadd.f32 1e-05, %v228_v28  ;;  %v54_v17 = vld [vmem:[%s602_s2 + $0x38] sm:$0xff] }
  0xfa   :  { %408 = vrcp.f32 %v194_v22  ;;  %v62_v20 = vld [vmem:[%s602_s2 + $0x78] sm:$0xff] }
  0xfb   :  { %410 = vrcp.f32 %v226_v23  ;;  %v52_v23 = vld [vmem:[%s602_s2 + $0x28] sm:$0xff] }
  0xfc   :  { %412 = vrcp.f32 %v205_v26  ;;  %v60_v26 = vld [vmem:[%s602_s2 + $0x68] sm:$0xff] }
  0xfd   :  { %414 = vrcp.f32 %v237_v29  ;;  %v362_v32 = vpop.f32.mrb[4].mxu0  ;;  %v370_v33 = vpop.f32.mrb[4].mxu1 }
  0xfe   :  { %416 = vrcp.f32 %v197_v30  ;;  %v218_v34 = vadd.f32 1e-05, %v362_v32  ;;  %v250_v35 = vadd.f32 1e-05, %v370_v33  ;;  %v209_v36 = vpop.f32.mrb[5].mxu0  ;;  %v241_v37 = vpop.f32.mrb[5].mxu1 }
  0xff   :  { %418 = vrcp.f32 %v229_v31  ;;  %v210_v38 = vadd.f32 1e-05, %v209_v36  ;;  %v242_v39 = vadd.f32 1e-05, %v241_v37  ;;  %v363_v40 = vpop.f32.mrb[6].mxu0  ;;  %v371_v41 = vpop.f32.mrb[6].mxu1 }
 0x100   :  { %420 = vrcp.f32 %v218_v34  ;;  %v221_v43 = vadd.f32 1e-05, %v363_v40  ;;  %v212_v44 = vpop.f32.mrb[7].mxu0  ;;  %v244_v45 = vpop.f32.mrb[7].mxu1  ;;  %v253_v47 = vadd.f32 1e-05, %v371_v41 }
 0x101   :  { %422 = vrcp.f32 %v250_v35  ;;  %v213_v50 = vadd.f32 1e-05, %v212_v44  ;;  %v245_v54 = vadd.f32 1e-05, %v244_v45 }
 0x102   :  { %v405_v48 = vpop.eup %404  ;;  %424 = vrcp.f32 %v210_v38 }
 0x103   :  { %v407_v51 = vpop.eup %406  ;;  %v261_v52 = vmul.f32 %v405_v48, %v49_v42  ;;  %426 = vrcp.f32 %v242_v39 }
 0x104   :  { %v409_v55 = vpop.eup %408  ;;  %v277_v56 = vmul.f32 %v407_v51, %v57_v46  ;;  %428 = vrcp.f32 %v221_v43 }
 0x105   :  { %v411_v58 = vpop.eup %410  ;;  %290 = vst [vmem:[%s603_s3 + $0x10] sm:$0xff] %v261_v52  ;;  %v257_v59 = vmul.f32 %v409_v55, %v47_v49  ;;  %430 = vrcp.f32 %v253_v47 }
 0x106   :  { %v413_v61 = vpop.eup %412  ;;  %298 = vst [vmem:[%s603_s3 + $0x50] sm:$0xff] %v277_v56  ;;  %v273_v62 = vmul.f32 %v411_v58, %v55_v53  ;;  %432 = vrcp.f32 %v213_v50 }
 0x107   :  { %v415_v0 = vpop.eup %414  ;;  %288 = vst [vmem:[%s603_s3] sm:$0xff] %v257_v59  ;;  %v263_v1 = vmul.f32 %v413_v61, %v50_v57  ;;  %434 = vrcp.f32 %v245_v54 }
 0x108   :  { %v417_v3 = vpop.eup %416  ;;  %296 = vst [vmem:[%s603_s3 + $0x40] sm:$0xff] %v273_v62  ;;  %v279_v4 = vmul.f32 %v415_v0, %v58_v60 }
 0x109   :  { %v419_v6 = vpop.eup %418  ;;  %291 = vst [vmem:[%s603_s3 + $0x18] sm:$0xff] %v263_v1  ;;  %v259_v7 = vmul.f32 %v417_v3, %v48_v63 }
 0x10a   :  { %v421_v9 = vpop.eup %420  ;;  %299 = vst [vmem:[%s603_s3 + $0x58] sm:$0xff] %v279_v4  ;;  %v275_v10 = vmul.f32 %v419_v6, %v56_v2 }
 0x10b   :  { %v423_v12 = vpop.eup %422  ;;  %289 = vst [vmem:[%s603_s3 + $0x8] sm:$0xff] %v259_v7  ;;  %v269_v13 = vmul.f32 %v421_v9, %v53_v5 }
 0x10c   :  { %v425_v15 = vpop.eup %424  ;;  %297 = vst [vmem:[%s603_s3 + $0x48] sm:$0xff] %v275_v10  ;;  %v285_v16 = vmul.f32 %v423_v12, %v61_v8 }
 0x10d   :  { %v427_v18 = vpop.eup %426  ;;  %294 = vst [vmem:[%s603_s3 + $0x30] sm:$0xff] %v269_v13  ;;  %v265_v19 = vmul.f32 %v425_v15, %v51_v11 }
 0x10e   :  { %v429_v21 = vpop.eup %428  ;;  %302 = vst [vmem:[%s603_s3 + $0x70] sm:$0xff] %v285_v16  ;;  %v281_v22 = vmul.f32 %v427_v18, %v59_v14 }
 0x10f   :  { %v431_v24 = vpop.eup %430  ;;  %292 = vst [vmem:[%s603_s3 + $0x20] sm:$0xff] %v265_v19  ;;  %v271_v25 = vmul.f32 %v429_v21, %v54_v17 }
 0x110   :  { %v433_v27 = vpop.eup %432  ;;  %300 = vst [vmem:[%s603_s3 + $0x60] sm:$0xff] %v281_v22  ;;  %v287_v28 = vmul.f32 %v431_v24, %v62_v20 }
 0x111   :  { %v435_v29 = vpop.eup %434  ;;  %295 = vst [vmem:[%s603_s3 + $0x38] sm:$0xff] %v271_v25  ;;  %v267_v30 = vmul.f32 %v433_v27, %v52_v23 }
 0x112   :  { %303 = vst [vmem:[%s603_s3 + $0x78] sm:$0xff] %v287_v28  ;;  %v283_v31 = vmul.f32 %v435_v29, %v60_v26 }
 0x113   :  { %293 = vst [vmem:[%s603_s3 + $0x28] sm:$0xff] %v267_v30 }
 0x114   :  { %301 = vst [vmem:[%s603_s3 + $0x68] sm:$0xff] %v283_v31 }

</bundles_post_ra>
